<compile_context>
chip_gen: v6e
topology: v6e:2x2x1
jax: 0.10.0
libtpu: 0.0.40
codegen_flags: <defaults>
</compile_context>

<pallas_src>
import jax
import jax.numpy as jnp
from jax.experimental import pallas as pl
from jax.experimental.pallas import tpu as pltpu


def _bias2d_kernel(x_ref, b_ref, o_ref):
    # x_ref: (TM, HW)   b_ref: (TM, 1)   o_ref: (TM, HW)
    # Single fused VPU pass: load, add lane-broadcast bias, lane-dense store.
    o_ref[...] = x_ref[...] + b_ref[...]


def _sublane_multiple(dtype):
    # Sublane packing granularity: f32 -> 8, bf16/f16 -> 16, int8/fp8 -> 32.
    return max(8, 32 // jnp.dtype(dtype).itemsize)


def bias2d_forward(x_nchw, bias, *, target_block_bytes=4 << 20, donate_x=False):
    """Forward pass of Bias2d: out[n, c, h, w] = x[n, c, h, w] + bias[c].

    x_nchw : (N, C, H, W)    bias : (C,)
    Returns (N, C, H, W) — identical semantics to the PyTorch module.
    """
    N, C, H, W = x_nchw.shape
    HW = H * W
    rows = N * C
    itemsize = jnp.dtype(x_nchw.dtype).itemsize

    # Contiguous NCHW -> (N*C, H*W): pure metadata reshape, no data movement.
    x2 = x_nchw.reshape(rows, HW)
    # Tiny per-row bias column (N*C*itemsize bytes) — do NOT pre-broadcast
    # to HW; the in-kernel lane broadcast is free.
    b2 = jnp.tile(bias.astype(x_nchw.dtype), N).reshape(rows, 1)

    # Row-tile size: sublane-aligned, ~target_block_bytes per x/out block,
    # capped to the full row extent (small shapes -> a single whole block).
    sub = _sublane_multiple(x_nchw.dtype)
    tm = max(sub, (target_block_bytes // (HW * itemsize)) // sub * sub)
    if rows <= tm:
        tm = rows  # block equals full extent — always a legal block shape
    grid = (pl.cdiv(rows, tm),)

    cost = pl.CostEstimate(
        flops=rows * HW,
        bytes_accessed=2 * rows * HW * itemsize + rows * itemsize,
        transcendentals=0,
    )

    out2 = pl.pallas_call(
        _bias2d_kernel,
        out_shape=jax.ShapeDtypeStruct((rows, HW), x_nchw.dtype),
        grid=grid,
        in_specs=[
            pl.BlockSpec((tm, HW), lambda i: (i, 0)),   # x rows
            pl.BlockSpec((tm, 1), lambda i: (i, 0)),    # matching bias rows
        ],
        out_specs=pl.BlockSpec((tm, HW), lambda i: (i, 0)),
        compiler_params=pltpu.CompilerParams(
            dimension_semantics=("parallel",),   # v7x: both TCs stream tiles
            vmem_limit_bytes=32 << 20,           # 2x dbl-buffered 4 MiB blocks
        ),
        cost_estimate=cost,
        input_output_aliases=({0: 0} if donate_x else {}),
    )(x2, b2)

    return out2.reshape(N, C, H, W)


if __name__ == "__main__":
    # Module config consistent with Bias2d(channels=4) on a small image.
    # (For a shape this tiny a fused XLA add would be faster than any
    #  pallas_call; the tiling above pays off at realistic N*C*H*W.)
    N, C, H, W = 2, 4, 16, 16

    key = jax.random.PRNGKey(0)
    kx, kb = jax.random.split(key, 2)

    x = jax.random.normal(kx, (N, C, H, W), dtype=jnp.float32)
    # reset_parameters(): bias ~ N(0, 0.002)
    bias = 0.002 * jax.random.normal(kb, (C,), dtype=jnp.float32)

    out = bias2d_forward(x, bias)
    out = jax.block_until_ready(out)

    # Reference: plain broadcast add (same semantics as the PyTorch module).
    ref = x + bias[None, :, None, None]

    assert out.shape == (N, C, H, W), out.shape
    assert jnp.allclose(out, ref, atol=1e-6, rtol=1e-6), "mismatch vs reference"

    print("KERNEL_OK")
</pallas_src>

<mosaic_0001>
module attributes {stable_mosaic.version = 11 : i64} {
  func.func @_bias2d_kernel(%arg0: i32, %arg1: memref<8x256xf32, #tpu.memory_space<vmem>>, %arg2: memref<8x1xf32, #tpu.memory_space<vmem>>, %arg3: memref<8x256xf32, #tpu.memory_space<vmem>>) attributes {dimension_semantics = [#tpu.dimension_semantics<parallel>], iteration_bounds = array<i64: 1>, scalar_prefetch = 0 : i64, scratch_operands = 0 : i64, tpu.core_type = #tpu.core_type<tc>, window_params = [{transform_indices = @transform_0, window_bounds = array<i64: 8, 256>}, {transform_indices = @transform_1, window_bounds = array<i64: 8, 1>}, {transform_indices = @transform_2, window_bounds = array<i64: 8, 256>}]} {
    %c0 = arith.constant 0 : index
    %c0_0 = arith.constant 0 : index
    %0 = vector.load %arg1[%c0, %c0_0] : memref<8x256xf32, #tpu.memory_space<vmem>>, vector<8x256xf32>
    %c0_1 = arith.constant 0 : index
    %c0_2 = arith.constant 0 : index
    %1 = vector.load %arg2[%c0_1, %c0_2] : memref<8x1xf32, #tpu.memory_space<vmem>>, vector<8x1xf32>
    %2 = vector.broadcast %1 : vector<8x1xf32> to vector<8x256xf32>
    %3 = arith.addf %0, %2 : vector<8x256xf32>
    %c0_3 = arith.constant 0 : index
    %c0_4 = arith.constant 0 : index
    %4 = vector.load %arg3[%c0_3, %c0_4] : memref<8x256xf32, #tpu.memory_space<vmem>>, vector<8x256xf32>
    tpu.vector_store %arg3[%c0_3, %c0_4], %3 {strides = array<i32>} : memref<8x256xf32, #tpu.memory_space<vmem>>, vector<8x256xf32>,
    return
  }
  func.func @transform_0(%arg0: i32) -> (i32, i32) {
    %c0_i32 = arith.constant 0 : i32
    %c0_i32_0 = arith.constant 0 : i32
    return %arg0, %c0_i32 : i32, i32
  }
  func.func @transform_1(%arg0: i32) -> (i32, i32) {
    %c0_i32 = arith.constant 0 : i32
    %c0_i32_0 = arith.constant 0 : i32
    return %arg0, %c0_i32 : i32, i32
  }
  func.func @transform_2(%arg0: i32) -> (i32, i32) {
    %c0_i32 = arith.constant 0 : i32
    %c0_i32_0 = arith.constant 0 : i32
    return %arg0, %c0_i32 : i32, i32
  }
}

</mosaic_0001>

<bundles_post_ra>
// kernel: tpu_custom_call.1
= control target key start
LH: loop header
LB: loop body
LE: loop exit
PB: predicated region body
PF: predicated region fallthrough
CT: control target
= control target key end

     0   :  { %7 = vsyncpa [#allocation3], 0  ;;  %s126_s0 = inlined_call_operand.hbm [shape: f32[8,256], index: 0, kind: input, shape index: {}]   ;;  %s127_s1 = inlined_call_operand.vmem [shape: f32[8,1], index: 1, kind: input, shape index: {}]   ;;  %s128_s2 = inlined_call_operand.hbm [shape: f32[8,256], index: 2, kind: output, shape index: {}]  }
   0x1   :  { %8 = vsyncpa [#allocation4], 0  ;;  %s99_s9 = smov [#allocation2]  }
   0x2   :  { %s15_s10 = sshll.u32 %s99_s9, 4  ;;  %s16_s10 = int_to_ptr.vmem [resolvable:$true] %s15_s10 }
   0x3   :  { %s63_s11 = scalar_lea.vmem %s16_s10, 256  ;;  %p68_p1 = scmp.lt.s32.totalorder %s16_s10, %s16_s10 }
   0x4   :  { %p64_p0 = scmp.ne.s32.totalorder %s16_s10, %s63_s11  ;;  %p69_p2 = scmp.lt.s32.totalorder %s63_s11, %s63_s11 }
   0x6   :  { %p70_p3 = por %p69_p2, %p68_p1 }
   0x8   :  { %p71_p4 = pnand %p70_p3, %p64_p0 }
   0xa   :  { %74 = shalt.err (!%p71_p4)
}
   0xb   :  { %18 = dma.hbm_to_vmem [thread:$0]  %s126_s0, 256, %s16_s10, [#allocation3]  }
   0xc   :  { %95 = dma.done.wait [#allocation3], 256  }
   0xd   :  { %96 = vsyncadd [#allocation3], 4294967040  ;;  %v100_v0 = vmov 0   ;;  %v26_v1 = vld [vmem:[%s127_s1] sm:$0xff]  ;;  %v25_v3 = vld [vmem:[#allocation2 + $0x8] sm:$0xff]  ;;  %s101_s16 = smov [#allocation5]  }
   0xe   :  { %54 = vset.pattern.permute.xlu0 %v100_v0  ;;  %v24_v2 = vld [vmem:[#allocation2] sm:$0xff]  ;;  %s42_s17 = sshll.u32 %s101_s16, 4  ;;  %s43_s17 = int_to_ptr.vmem [resolvable:$true] %s42_s17 }
   0xf   :  { %29 = vperm.xlu0 %54, %v26_v1   ;;  %s75_s0 = scalar_lea.vmem %s43_s17, 256  ;;  %p80_p6 = scmp.lt.s32.totalorder %s43_s17, %s43_s17 }
  0x10   :  { %p76_p5 = scmp.ne.s32.totalorder %s43_s17, %s75_s0  ;;  %p81_p7 = scmp.lt.s32.totalorder %s75_s0, %s75_s0 }
  0x12   :  { %p82_p8 = por %p81_p7, %p80_p6 }
  0x14   :  { %p83_p9 = pnand %p82_p8, %p76_p5 }
  0x8a   :  { %v30_v4 = vpop.permute.xlu0 %29 }
  0x8b   :  { %v32_v5 = vadd.f32 %v30_v4, %v24_v2  ;;  %v33_v6 = vadd.f32 %v30_v4, %v25_v3 }
  0x8d   :  { %34 = vst [vmem:[#allocation5] sm:$0xff] %v32_v5  ;;  %35 = vst [vmem:[#allocation5 + $0x8] sm:$0xff] %v33_v6 }
  0x8e   :  { %86 = shalt.err (!%p83_p9)
}
  0x8f   :  { %45 = dma.vmem_to_hbm [thread:$0]  %s43_s17, 256, %s128_s2, [#allocation4]  }
  0x90   :  { %97 = dma.done.wait [#allocation4], 256  }
  0x91   :  { %98 = vsyncadd [#allocation4], 4294967040 }
  0x92   :  { %49 = vsyncpa [#allocation3], 1 }
  0x93   :  { %50 = vsyncpa [#allocation4], 1 }

</bundles_post_ra>
